<compile_context>
chip_gen: v7x
topology: tpu7x:2x2x1
jax: 0.10.0
libtpu: 0.0.40
codegen_flags: <defaults>
</compile_context>

<pallas_src>
import dataclasses
from typing import Optional, Tuple

import numpy as np
import jax
import jax.numpy as jnp
from jax.experimental import pallas as pl
from jax.experimental.pallas import tpu as pltpu


def _round_up(x, m):
    return ((x + m - 1) // m) * m


# ----------------------------------------------------------------------------
# Architecture setup (mirrors the numpy logic in AutoEncoderModel.__init__)
# ----------------------------------------------------------------------------
def build_layer_pairs(input_length: int, hidden_size: int):
    dec_steps = 2 ** np.arange(
        max(np.ceil(np.log2(hidden_size)), 2), np.log2(input_length)
    )[1:]
    dec_setup = np.concatenate([[hidden_size], dec_steps.repeat(2), [input_length]])
    enc_setup = dec_setup[::-1]
    enc_pairs = [(int(a), int(b)) for a, b in enc_setup.reshape(-1, 2)]
    dec_pairs = [(int(a), int(b)) for a, b in dec_setup.reshape(-1, 2)]
    return enc_pairs, dec_pairs


# ----------------------------------------------------------------------------
# Deterministic parameter init (PyTorch nn.Linear default: U(-1/sqrt(in), ..));
# weights stored pre-transposed as (in_features, out_features)
# ----------------------------------------------------------------------------
def init_params(key, pairs):
    params = []
    for fan_in, fan_out in pairs:
        key, kw, kb = jax.random.split(key, 3)
        bound = 1.0 / np.sqrt(fan_in)
        w = jax.random.uniform(kw, (fan_in, fan_out), jnp.float32, -bound, bound)
        b = jax.random.uniform(kb, (1, fan_out), jnp.float32, -bound, bound)
        params.append((w, b))
    return key, params


# ----------------------------------------------------------------------------
# One-time parameter packing (model-load time, NOT per forward call)
# ----------------------------------------------------------------------------
@dataclasses.dataclass(frozen=True)
class PackedAutoEncoder:
    weights: Tuple[jax.Array, ...]        # bf16, (fi_pad, fo_pad) per layer
    biases: Tuple[jax.Array, ...]         # f32,  (1, fo_pad) per layer
    tanh_flags: Tuple[bool, ...]
    enc_layer_idx: Optional[int]          # layer whose output is the latent (None if fused)
    input_length: int
    hidden_size: int
    d_in: int                             # round_up(input_length, 128)
    out_width: int                        # round_up(input_length, 128)
    latent_width: int                     # round_up(hidden_size, 128)


def pack_autoencoder_params(enc_params, dec_params, input_length, hidden_size,
                            fuse_latent: bool):
    """Host-side, one-time packing.  fuse_latent=True folds the tanh-free
    encoder-last/decoder-first pair into a single GEMM (valid only when the
    latent does not need to be materialized)."""
    n_enc, n_dec = len(enc_params), len(dec_params)
    layers = []
    for i, (w, b) in enumerate(enc_params):
        layers.append([np.asarray(w, np.float32),
                       np.asarray(b, np.float32).reshape(1, -1),
                       i < n_enc - 1])            # tanh after all but last encoder layer
    for i, (w, b) in enumerate(dec_params):
        layers.append([np.asarray(w, np.float32),
                       np.asarray(b, np.float32).reshape(1, -1),
                       i < n_dec - 1])            # tanh after all but last decoder layer
    enc_layer_idx = n_enc - 1                     # layer whose output is the latent

    if fuse_latent:
        # No tanh between encoder-last and decoder-first -> fold into one GEMM (f32, once).
        w1, b1, _ = layers[enc_layer_idx]
        w2, b2, t2 = layers[enc_layer_idx + 1]
        layers = (layers[:enc_layer_idx]
                  + [[w1 @ w2, b1 @ w2 + b2, t2]]
                  + layers[enc_layer_idx + 2:])
        enc_layer_idx = None

    weights, biases, tanh_flags = [], [], []
    for w, b, t in layers:
        fi, fo = w.shape
        fi_pad, fo_pad = _round_up(fi, 128), _round_up(fo, 128)
        w_pad = np.zeros((fi_pad, fo_pad), np.float32)
        w_pad[:fi, :fo] = w                                   # zero padding is exact:
        b_pad = np.zeros((1, fo_pad), np.float32)             # 0*x + 0 -> tanh(0) = 0
        b_pad[:, :fo] = b
        weights.append(jnp.asarray(w_pad).astype(jnp.bfloat16))
        biases.append(jnp.asarray(b_pad))
        tanh_flags.append(bool(t))

    return PackedAutoEncoder(
        weights=tuple(weights), biases=tuple(biases), tanh_flags=tuple(tanh_flags),
        enc_layer_idx=enc_layer_idx, input_length=input_length, hidden_size=hidden_size,
        d_in=_round_up(input_length, 128),
        out_width=_round_up(input_length, 128),
        latent_width=_round_up(hidden_size, 128))


# ----------------------------------------------------------------------------
# Pallas kernel: full Linear/Tanh chain, weights VMEM-resident, bf16 MXU
# ----------------------------------------------------------------------------
def make_autoencoder_kernel(n_layers, tanh_flags, enc_layer_idx, emit_latent):
    def kernel(x_ref, *refs):
        w_refs = refs[0:2 * n_layers:2]
        b_refs = refs[1:2 * n_layers:2]
        out_refs = refs[2 * n_layers:]
        h = x_ref[...]                                        # (TM, d_in) f32
        for l in range(n_layers):                             # static unroll
            # Native bf16 MXU matmul with f32 accumulation; only the (TM, fi)
            # activation is cast, the bf16 weight block is fed directly.
            h = jnp.dot(h.astype(jnp.bfloat16), w_refs[l][...],
                        preferred_element_type=jnp.float32) + b_refs[l][...]
            if tanh_flags[l]:
                h = jnp.tanh(h)                               # f32 (portable incl. v5e)
            if emit_latent and l == enc_layer_idx:
                out_refs[1][...] = h                          # (TM, latent_width)
        out_refs[0][...] = h                                  # (TM, out_width)
    return kernel


def _choose_tile_m(batch):
    """Batch-tile rows: multiple of 8; >= 2 tiles for B > 128 so the 'parallel'
    grid axis can shard across v7x's two TensorCores."""
    if batch <= 128:
        return _round_up(max(batch, 8), 8)
    half_tiles = (batch // 2) // 128 * 128         # largest 128-multiple <= batch/2
    return int(max(128, min(512, half_tiles)))


def _vmem_limit_bytes(tm, packed, emit_latent):
    act = 2 * tm * packed.d_in * 4                            # double-buffered input tile
    out = 2 * tm * packed.out_width * 4
    lat = 2 * tm * packed.latent_width * 4 if emit_latent else 0
    wts = sum(2 * int(np.prod(w.shape)) * 2 for w in packed.weights)
    bs = sum(2 * int(np.prod(b.shape)) * 4 for b in packed.biases)
    need = act + out + lat + wts + bs
    # Explicit scoped limit: v5e default is only 16 MiB; cap at v7x's 64 MiB physical.
    return int(min(max(32 * 1024 * 1024, 2 * need), 64 * 1024 * 1024))


# ----------------------------------------------------------------------------
# Forward wrapper (per-call cost: feature-dim pad + pallas_call + slice)
# ----------------------------------------------------------------------------
def autoencoder_forward(ts_batch, packed: PackedAutoEncoder, return_latent: bool = False):
    if return_latent and packed.enc_layer_idx is None:
        raise ValueError("latent was fused away; pack with fuse_latent=False")
    B = ts_batch.shape[0]
    x = ts_batch.reshape(B, -1).astype(jnp.float32)
    assert x.shape[1] == packed.input_length

    # Feature-dim zero pad only (required for exactness of padded lanes); the batch
    # axis is covered by a partial last grid tile (rows are independent).
    x_pad = jnp.pad(x, ((0, 0), (0, packed.d_in - packed.input_length)))

    tm = _choose_tile_m(B)
    grid = (pl.cdiv(B, tm),)
    n_layers = len(packed.weights)

    in_specs = [pl.BlockSpec((tm, packed.d_in), lambda i: (i, 0))]      # x rows (tiled)
    args = [x_pad]
    for w, b in zip(packed.weights, packed.biases):
        in_specs.append(pl.BlockSpec(w.shape, lambda i: (0, 0)))        # resident weight
        in_specs.append(pl.BlockSpec(b.shape, lambda i: (0, 0)))        # resident bias
        args.extend([w, b])

    recon_spec = pl.BlockSpec((tm, packed.out_width), lambda i: (i, 0))
    if return_latent:
        out_shape = (jax.ShapeDtypeStruct((B, packed.out_width), jnp.float32),
                     jax.ShapeDtypeStruct((B, packed.latent_width), jnp.float32))
        out_specs = (recon_spec,
                     pl.BlockSpec((tm, packed.latent_width), lambda i: (i, 0)))
    else:
        out_shape = jax.ShapeDtypeStruct((B, packed.out_width), jnp.float32)
        out_specs = recon_spec

    kernel = make_autoencoder_kernel(n_layers, packed.tanh_flags,
                                     packed.enc_layer_idx, return_latent)

    result = pl.pallas_call(
        kernel,
        out_shape=out_shape,
        grid_spec=pltpu.PrefetchScalarGridSpec(
            num_scalar_prefetch=0,
            grid=grid,
            in_specs=in_specs,
            out_specs=out_specs,
        ),
        compiler_params=pltpu.CompilerParams(
            dimension_semantics=("parallel",),
            vmem_limit_bytes=_vmem_limit_bytes(tm, packed, return_latent),
        ),
    )(*args)

    # TODO(synk): for a strictly HBM-bound serving path, carry x/outputs in bfloat16 to
    # halve activation HBM traffic (explicit accuracy-budget decision, so not default).

    if return_latent:
        recon_pad, lat_pad = result
        recon = recon_pad[:, :packed.input_length].reshape(ts_batch.shape)
        latent = lat_pad[:, :packed.hidden_size]
        return recon, latent
    return result[:, :packed.input_length].reshape(ts_batch.shape)


# ----------------------------------------------------------------------------
# References (for sanity checks)
# ----------------------------------------------------------------------------
def packed_reference(ts_batch, packed):
    """Same math as the kernel (bf16 weights, bf16 activation casts, f32 accum)."""
    B = ts_batch.shape[0]
    x = ts_batch.reshape(B, -1).astype(jnp.float32)
    h = jnp.pad(x, ((0, 0), (0, packed.d_in - packed.input_length)))
    enc = None
    for l, (w, b) in enumerate(zip(packed.weights, packed.biases)):
        h = jnp.dot(h.astype(jnp.bfloat16), w,
                    preferred_element_type=jnp.float32) + b
        if packed.tanh_flags[l]:
            h = jnp.tanh(h)
        if packed.enc_layer_idx is not None and l == packed.enc_layer_idx:
            enc = h
    return h, enc


def f32_reference(ts_batch, enc_params, dec_params):
    """Unfused full-f32 reference (PyTorch-module semantics)."""
    B = ts_batch.shape[0]
    h = ts_batch.reshape(B, -1).astype(jnp.float32)
    for i, (w, b) in enumerate(enc_params):
        h = h @ w + b
        if i < len(enc_params) - 1:
            h = jnp.tanh(h)
    enc = h
    for i, (w, b) in enumerate(dec_params):
        h = h @ w + b
        if i < len(dec_params) - 1:
            h = jnp.tanh(h)
    return h.reshape(ts_batch.shape), enc


if __name__ == "__main__":
    # small config: ts_batch (B=2, S=8, F=16)  =>  input_length = 128, hidden = 32
    B, S, F = 2, 8, 16
    input_length = S * F
    hidden_size = 32

    enc_pairs, dec_pairs = build_layer_pairs(input_length, hidden_size)
    # enc_pairs = [(128, 64), (64, 32)] ; dec_pairs = [(32, 64), (64, 128)]

    key = jax.random.PRNGKey(0)
    key, enc_params = init_params(key, enc_pairs)
    key, dec_params = init_params(key, dec_pairs)
    key, kx, kb = jax.random.split(key, 3)
    ts_batch = jax.random.normal(kx, (B, S, F), dtype=jnp.float32)

    # ---- one-time packing (model-load time, not per call) --------------------------
    packed_unfused = pack_autoencoder_params(enc_params, dec_params, input_length,
                                             hidden_size, fuse_latent=False)
    packed_fused = pack_autoencoder_params(enc_params, dec_params, input_length,
                                           hidden_size, fuse_latent=True)

    # ---- (1) return_latent=True: unfused chain, latent emitted ---------------------
    recon, latent = autoencoder_forward(ts_batch, packed_unfused, return_latent=True)
    recon, latent = jax.block_until_ready((recon, latent))
    assert recon.shape == ts_batch.shape
    assert latent.shape == (B, hidden_size)

    ref_out, ref_enc = packed_reference(ts_batch, packed_unfused)
    np.testing.assert_allclose(
        np.asarray(recon),
        np.asarray(ref_out[:, :input_length].reshape(ts_batch.shape)),
        rtol=1e-3, atol=1e-3)
    np.testing.assert_allclose(
        np.asarray(latent), np.asarray(ref_enc[:, :hidden_size]),
        rtol=1e-3, atol=1e-3)

    # ---- (2) return_latent=False: enc-last/dec-first fused, no latent write --------
    recon2 = jax.block_until_ready(
        autoencoder_forward(ts_batch, packed_fused, return_latent=False))
    ref_out2, _ = packed_reference(ts_batch, packed_fused)
    np.testing.assert_allclose(
        np.asarray(recon2),
        np.asarray(ref_out2[:, :input_length].reshape(ts_batch.shape)),
        rtol=1e-3, atol=1e-3)

    # semantic check vs. the pure-f32 unfused model (bf16 weights/activations + fusion)
    f32_out, f32_enc = f32_reference(ts_batch, enc_params, dec_params)
    np.testing.assert_allclose(np.asarray(recon2), np.asarray(f32_out),
                               rtol=5e-2, atol=5e-2)
    np.testing.assert_allclose(np.asarray(latent), np.asarray(f32_enc),
                               rtol=5e-2, atol=5e-2)

    # ---- (3) larger batch: multi-tile grid with a partial (masked) last tile -------
    B_big = 300                       # tm=128 -> grid=(3,), last tile has 44 live rows
    ts_big = jax.random.normal(kb, (B_big, S, F), dtype=jnp.float32)
    recon_big = jax.block_until_ready(
        autoencoder_forward(ts_big, packed_fused, return_latent=False))
    ref_big, _ = packed_reference(ts_big, packed_fused)
    np.testing.assert_allclose(
        np.asarray(recon_big),
        np.asarray(ref_big[:, :input_length].reshape(ts_big.shape)),
        rtol=1e-3, atol=1e-3)

    print("KERNEL_OK")
</pallas_src>

<mosaic_0001>
module attributes {stable_mosaic.version = 11 : i64} {
  func.func @kernel(%arg0: i32, %arg1: memref<8x128xf32, #tpu.memory_space<vmem>>, %arg2: memref<128x128xbf16, #tpu.memory_space<vmem>>, %arg3: memref<1x128xf32, #tpu.memory_space<vmem>>, %arg4: memref<128x128xbf16, #tpu.memory_space<vmem>>, %arg5: memref<1x128xf32, #tpu.memory_space<vmem>>, %arg6: memref<128x128xbf16, #tpu.memory_space<vmem>>, %arg7: memref<1x128xf32, #tpu.memory_space<vmem>>, %arg8: memref<128x128xbf16, #tpu.memory_space<vmem>>, %arg9: memref<1x128xf32, #tpu.memory_space<vmem>>, %arg10: memref<8x128xf32, #tpu.memory_space<vmem>>, %arg11: memref<8x128xf32, #tpu.memory_space<vmem>>) attributes {dimension_semantics = [#tpu.dimension_semantics<parallel>], iteration_bounds = array<i64: 1>, scalar_prefetch = 0 : i64, scratch_operands = 0 : i64, tpu.core_type = #tpu.core_type<tc>, window_params = [{transform_indices = @transform_0, window_bounds = array<i64: 8, 128>}, {pipeline_mode = #tpu.pipeline_mode<synchronous>, transform_indices = @transform_1, window_bounds = array<i64: 128, 128>}, {pipeline_mode = #tpu.pipeline_mode<synchronous>, transform_indices = @transform_2, window_bounds = array<i64: 1, 128>}, {pipeline_mode = #tpu.pipeline_mode<synchronous>, transform_indices = @transform_3, window_bounds = array<i64: 128, 128>}, {pipeline_mode = #tpu.pipeline_mode<synchronous>, transform_indices = @transform_4, window_bounds = array<i64: 1, 128>}, {pipeline_mode = #tpu.pipeline_mode<synchronous>, transform_indices = @transform_5, window_bounds = array<i64: 128, 128>}, {pipeline_mode = #tpu.pipeline_mode<synchronous>, transform_indices = @transform_6, window_bounds = array<i64: 1, 128>}, {pipeline_mode = #tpu.pipeline_mode<synchronous>, transform_indices = @transform_7, window_bounds = array<i64: 128, 128>}, {pipeline_mode = #tpu.pipeline_mode<synchronous>, transform_indices = @transform_8, window_bounds = array<i64: 1, 128>}, {transform_indices = @transform_9, window_bounds = array<i64: 8, 128>}, {transform_indices = @transform_10, window_bounds = array<i64: 8, 128>}]} {
    %c0 = arith.constant 0 : index
    %c0_0 = arith.constant 0 : index
    %0 = vector.load %arg1[%c0, %c0_0] : memref<8x128xf32, #tpu.memory_space<vmem>>, vector<8x128xf32>
    %1 = arith.truncf %0 : vector<8x128xf32> to vector<8x128xbf16>
    %c0_1 = arith.constant 0 : index
    %c0_2 = arith.constant 0 : index
    %2 = vector.load %arg2[%c0_1, %c0_2] : memref<128x128xbf16, #tpu.memory_space<vmem>>, vector<128x128xbf16>
    %cst = arith.constant dense<0.000000e+00> : vector<8x128xf32>
    %3 = tpu.matmul %1, %2, %cst {dimension_numbers = #tpu.dot_dimension_numbers<[1], [0], [0], [1], [0, 0, 1, 1], [], []>} : vector<8x128xbf16>, vector<128x128xbf16>, vector<8x128xf32> -> vector<8x128xf32>
    %c0_3 = arith.constant 0 : index
    %c0_4 = arith.constant 0 : index
    %4 = vector.load %arg3[%c0_3, %c0_4] : memref<1x128xf32, #tpu.memory_space<vmem>>, vector<1x128xf32>
    %5 = vector.broadcast %4 : vector<1x128xf32> to vector<8x128xf32>
    %6 = arith.addf %3, %5 : vector<8x128xf32>
    %7 = math.tanh %6 : vector<8x128xf32>
    %8 = arith.truncf %7 : vector<8x128xf32> to vector<8x128xbf16>
    %c0_5 = arith.constant 0 : index
    %c0_6 = arith.constant 0 : index
    %9 = vector.load %arg4[%c0_5, %c0_6] : memref<128x128xbf16, #tpu.memory_space<vmem>>, vector<128x128xbf16>
    %cst_7 = arith.constant dense<0.000000e+00> : vector<8x128xf32>
    %10 = tpu.matmul %8, %9, %cst_7 {dimension_numbers = #tpu.dot_dimension_numbers<[1], [0], [0], [1], [0, 0, 1, 1], [], []>} : vector<8x128xbf16>, vector<128x128xbf16>, vector<8x128xf32> -> vector<8x128xf32>
    %c0_8 = arith.constant 0 : index
    %c0_9 = arith.constant 0 : index
    %11 = vector.load %arg5[%c0_8, %c0_9] : memref<1x128xf32, #tpu.memory_space<vmem>>, vector<1x128xf32>
    %12 = vector.broadcast %11 : vector<1x128xf32> to vector<8x128xf32>
    %13 = arith.addf %10, %12 : vector<8x128xf32>
    %c0_10 = arith.constant 0 : index
    %c0_11 = arith.constant 0 : index
    %14 = vector.load %arg11[%c0_10, %c0_11] : memref<8x128xf32, #tpu.memory_space<vmem>>, vector<8x128xf32>
    tpu.vector_store %arg11[%c0_10, %c0_11], %13 {strides = array<i32>} : memref<8x128xf32, #tpu.memory_space<vmem>>, vector<8x128xf32>,
    %15 = arith.truncf %13 : vector<8x128xf32> to vector<8x128xbf16>
    %c0_12 = arith.constant 0 : index
    %c0_13 = arith.constant 0 : index
    %16 = vector.load %arg6[%c0_12, %c0_13] : memref<128x128xbf16, #tpu.memory_space<vmem>>, vector<128x128xbf16>
    %cst_14 = arith.constant dense<0.000000e+00> : vector<8x128xf32>
    %17 = tpu.matmul %15, %16, %cst_14 {dimension_numbers = #tpu.dot_dimension_numbers<[1], [0], [0], [1], [0, 0, 1, 1], [], []>} : vector<8x128xbf16>, vector<128x128xbf16>, vector<8x128xf32> -> vector<8x128xf32>
    %c0_15 = arith.constant 0 : index
    %c0_16 = arith.constant 0 : index
    %18 = vector.load %arg7[%c0_15, %c0_16] : memref<1x128xf32, #tpu.memory_space<vmem>>, vector<1x128xf32>
    %19 = vector.broadcast %18 : vector<1x128xf32> to vector<8x128xf32>
    %20 = arith.addf %17, %19 : vector<8x128xf32>
    %21 = math.tanh %20 : vector<8x128xf32>
    %22 = arith.truncf %21 : vector<8x128xf32> to vector<8x128xbf16>
    %c0_17 = arith.constant 0 : index
    %c0_18 = arith.constant 0 : index
    %23 = vector.load %arg8[%c0_17, %c0_18] : memref<128x128xbf16, #tpu.memory_space<vmem>>, vector<128x128xbf16>
    %cst_19 = arith.constant dense<0.000000e+00> : vector<8x128xf32>
    %24 = tpu.matmul %22, %23, %cst_19 {dimension_numbers = #tpu.dot_dimension_numbers<[1], [0], [0], [1], [0, 0, 1, 1], [], []>} : vector<8x128xbf16>, vector<128x128xbf16>, vector<8x128xf32> -> vector<8x128xf32>
    %c0_20 = arith.constant 0 : index
    %c0_21 = arith.constant 0 : index
    %25 = vector.load %arg9[%c0_20, %c0_21] : memref<1x128xf32, #tpu.memory_space<vmem>>, vector<1x128xf32>
    %26 = vector.broadcast %25 : vector<1x128xf32> to vector<8x128xf32>
    %27 = arith.addf %24, %26 : vector<8x128xf32>
    %c0_22 = arith.constant 0 : index
    %c0_23 = arith.constant 0 : index
    %28 = vector.load %arg10[%c0_22, %c0_23] : memref<8x128xf32, #tpu.memory_space<vmem>>, vector<8x128xf32>
    tpu.vector_store %arg10[%c0_22, %c0_23], %27 {strides = array<i32>} : memref<8x128xf32, #tpu.memory_space<vmem>>, vector<8x128xf32>,
    return
  }
  func.func @transform_0(%arg0: i32) -> (i32, i32) {
    %c0_i32 = arith.constant 0 : i32
    %c0_i32_0 = arith.constant 0 : i32
    return %arg0, %c0_i32 : i32, i32
  }
  func.func @transform_1(%arg0: i32) -> (i32, i32) {
    %c0_i32 = arith.constant 0 : i32
    %c0_i32_0 = arith.constant 0 : i32
    %c0_i32_1 = arith.constant 0 : i32
    return %c0_i32, %c0_i32_0 : i32, i32
  }
  func.func @transform_2(%arg0: i32) -> (i32, i32) {
    %c0_i32 = arith.constant 0 : i32
    %c0_i32_0 = arith.constant 0 : i32
    %c0_i32_1 = arith.constant 0 : i32
    return %c0_i32, %c0_i32_0 : i32, i32
  }
  func.func @transform_3(%arg0: i32) -> (i32, i32) {
    %c0_i32 = arith.constant 0 : i32
    %c0_i32_0 = arith.constant 0 : i32
    %c0_i32_1 = arith.constant 0 : i32
    return %c0_i32, %c0_i32_0 : i32, i32
  }
  func.func @transform_4(%arg0: i32) -> (i32, i32) {
    %c0_i32 = arith.constant 0 : i32
    %c0_i32_0 = arith.constant 0 : i32
    %c0_i32_1 = arith.constant 0 : i32
    return %c0_i32, %c0_i32_0 : i32, i32
  }
  func.func @transform_5(%arg0: i32) -> (i32, i32) {
    %c0_i32 = arith.constant 0 : i32
    %c0_i32_0 = arith.constant 0 : i32
    %c0_i32_1 = arith.constant 0 : i32
    return %c0_i32, %c0_i32_0 : i32, i32
  }
  func.func @transform_6(%arg0: i32) -> (i32, i32) {
    %c0_i32 = arith.constant 0 : i32
    %c0_i32_0 = arith.constant 0 : i32
    %c0_i32_1 = arith.constant 0 : i32
    return %c0_i32, %c0_i32_0 : i32, i32
  }
  func.func @transform_7(%arg0: i32) -> (i32, i32) {
    %c0_i32 = arith.constant 0 : i32
    %c0_i32_0 = arith.constant 0 : i32
    %c0_i32_1 = arith.constant 0 : i32
    return %c0_i32, %c0_i32_0 : i32, i32
  }
  func.func @transform_8(%arg0: i32) -> (i32, i32) {
    %c0_i32 = arith.constant 0 : i32
    %c0_i32_0 = arith.constant 0 : i32
    %c0_i32_1 = arith.constant 0 : i32
    return %c0_i32, %c0_i32_0 : i32, i32
  }
  func.func @transform_9(%arg0: i32) -> (i32, i32) {
    %c0_i32 = arith.constant 0 : i32
    %c0_i32_0 = arith.constant 0 : i32
    return %arg0, %c0_i32 : i32, i32
  }
  func.func @transform_10(%arg0: i32) -> (i32, i32) {
    %c0_i32 = arith.constant 0 : i32
    %c0_i32_0 = arith.constant 0 : i32
    return %arg0, %c0_i32 : i32, i32
  }
}

</mosaic_0001>

<bundles_post_ra>
// kernel: tpu_custom_call.1
= control target key start
LH: loop header
LB: loop body
LE: loop exit
PB: predicated region body
PF: predicated region fallthrough
CT: control target
= control target key end

     0   :  { %16 = vsyncpa [#allocation3], 0  ;;  %s1183_s0 = inlined_call_operand.hbm [shape: f32[2,128], index: 0, kind: input, shape index: {}]   ;;  %s1184_s1 = inlined_call_operand.hbm [shape: bf16[128,128], index: 1, kind: input, shape index: {}]   ;;  %s1185_s2 = inlined_call_operand.vmem [shape: f32[1,128], index: 2, kind: input, shape index: {}]   ;;  %s1186_s3 = inlined_call_operand.hbm [shape: bf16[128,128], index: 3, kind: input, shape index: {}]   ;;  %s1187_s4 = inlined_call_operand.vmem [shape: f32[1,128], index: 4, kind: input, shape index: {}]   ;;  %s1188_s5 = inlined_call_operand.hbm [shape: bf16[128,128], index: 5, kind: input, shape index: {}]   ;;  %s1189_s6 = inlined_call_operand.vmem [shape: f32[1,128], index: 6, kind: input, shape index: {}]   ;;  %s1190_s7 = inlined_call_operand.hbm [shape: bf16[128,128], index: 7, kind: input, shape index: {}]   ;;  %s1191_s8 = inlined_call_operand.vmem [shape: f32[1,128], index: 8, kind: input, shape index: {}]   ;;  %s1192_s9 = inlined_call_operand.hbm [shape: f32[2,128], index: 9, kind: output, shape index: {0}]   ;;  %s1193_s10 = inlined_call_operand.hbm [shape: f32[2,128], index: 10, kind: output, shape index: {1}]  }
   0x1   :  { %17 = vsyncpa [#allocation6], 0 }
   0x2   :  { %18 = vsyncpa [#allocation9], 0 }
   0x3   :  { %19 = vsyncpa [#allocation4], 0 }
   0x4   :  { %20 = vsyncpa [#allocation13], 0 }
   0x5   :  { %25 = vsyncadd [#allocation3], 96  ;;  %s958_s13 = smov [#allocation5]   ;;  %s794_s17 = scalar_lea.hbm %s1184_s1, 1024 }
   0x6   :  { %s38_s14 = sshll.u32 %s958_s13, 4  ;;  %p795_p0 = scmp.ne.s32.totalorder %s1184_s1, %s794_s17  ;;  %s39_s14 = int_to_ptr.vmem [resolvable:$true] %s38_s14 }
   0x7   :  { %p798_p1 = scmp.lt.u32.totalorder %s794_s17, %s1184_s1 }
   0x9   :  { %p800_p2 = pnand %p798_p1, %p795_p0 }
   0xb   :  { %803 = shalt.err (!%p800_p2)
}
   0xc   :  { %s804_s22 = scalar_lea.vmem %s39_s14, 1024  ;;  %p809_p4 = scmp.lt.s32.totalorder %s39_s14, %s39_s14 }
   0xd   :  { %p805_p3 = scmp.ne.s32.totalorder %s39_s14, %s804_s22  ;;  %p810_p5 = scmp.lt.s32.totalorder %s804_s22, %s804_s22 }
   0xf   :  { %p811_p6 = por %p810_p5, %p809_p4 }
  0x11   :  { %p812_p7 = pnand %p811_p6, %p805_p3 }
  0x13   :  { %815 = shalt.err (!%p812_p7)
}
  0x14   :  { %s959_s23 = smov 64   ;;  %s960_s24 = smov 4  }
  0x15   :  { %44 = dma.hbm_to_vmem [thread:$0]  %s1184_s1, 1024, %s39_s14, [#allocation6], %s959_s23, %s959_s23, %s960_s24  }
  0x16   :  { %s961_s27 = smov [#allocation8]   ;;  %s962_s29 = smov [#allocation2]  }
  0x17   :  { %s66_s28 = sshll.u32 %s961_s27, 4  ;;  %s26_s30 = sshll.u32 %s962_s29, 4  ;;  %s67_s28 = int_to_ptr.vmem [resolvable:$true] %s66_s28  ;;  %s27_s30 = int_to_ptr.vmem [resolvable:$true] %s26_s30 }
  0x18   :  { %s816_s13 = scalar_lea.hbm %s1188_s5, 1024 }
  0x19   :  { %p817_p8 = scmp.ne.s32.totalorder %s1188_s5, %s816_s13  ;;  %p820_p9 = scmp.lt.u32.totalorder %s816_s13, %s1188_s5 }
  0x1b   :  { %p822_p10 = pnand %p820_p9, %p817_p8 }
  0x1d   :  { %825 = shalt.err (!%p822_p10)
}
  0x1e   :  { %s826_s1 = scalar_lea.vmem %s67_s28, 1024  ;;  %p831_p12 = scmp.lt.s32.totalorder %s67_s28, %s67_s28 }
  0x1f   :  { %p827_p11 = scmp.ne.s32.totalorder %s67_s28, %s826_s1  ;;  %p832_p13 = scmp.lt.s32.totalorder %s826_s1, %s826_s1 }
  0x21   :  { %p833_p0 = por %p832_p13, %p831_p12 }
  0x23   :  { %p834_p1 = pnand %p833_p0, %p827_p11 }
  0x25   :  { %837 = shalt.err (!%p834_p1)
}
  0x26   :  { %72 = dma.hbm_to_vmem [thread:$0]  %s1188_s5, 1024, %s67_s28, [#allocation9], %s959_s23, %s959_s23, %s960_s24  }
  0x27   :  { %s838_s22 = scalar_lea.hbm %s1183_s0, 32 }
  0x28   :  { %p839_p2 = scmp.ne.s32.totalorder %s1183_s0, %s838_s22  ;;  %p842_p3 = scmp.lt.u32.totalorder %s838_s22, %s1183_s0 }
  0x2a   :  { %p844_p4 = pnand %p842_p3, %p839_p2 }
  0x2c   :  { %847 = shalt.err (!%p844_p4)
}
  0x2d   :  { %s848_s11 = scalar_lea.vmem %s27_s30, 32  ;;  %s852_s12 = scalar_lea.vmem %s27_s30, 128 }
  0x2e   :  { %p849_p5 = scmp.ne.s32.totalorder %s27_s30, %s848_s11  ;;  %p853_p6 = scmp.lt.s32.totalorder %s27_s30, %s27_s30 }
  0x2f   :  { %p854_p7 = scmp.lt.s32.totalorder %s852_s12, %s848_s11 }
  0x31   :  { %p855_p8 = por %p854_p7, %p853_p6 }
  0x33   :  { %p856_p9 = pnand %p855_p8, %p849_p5 }
  0x35   :  { %859 = shalt.err (!%p856_p9)
}
  0x36   :  { %s963_s5 = smov 32   ;;  %s964_s28 = smov 2  }
  0x37   :  { %32 = dma.hbm_to_vmem [thread:$0]  %s1183_s0, 32, %s27_s30, [#allocation3], %s963_s5, %s963_s5, %s964_s28  }
  0x38   :  { %s965_s16 = smov [#allocation7]   ;;  %s966_s18 = smov [#allocation10]  }
  0x39   :  { %s52_s17 = sshll.u32 %s965_s16, 4  ;;  %s80_s1 = sshll.u32 %s966_s18, 4  ;;  %s53_s17 = int_to_ptr.vmem [resolvable:$true] %s52_s17  ;;  %s81_s1 = int_to_ptr.vmem [resolvable:$true] %s80_s1 }
  0x3a   :  { %s860_s20 = scalar_lea.hbm %s1186_s3, 1024 }
  0x3b   :  { %p861_p10 = scmp.ne.s32.totalorder %s1186_s3, %s860_s20  ;;  %p864_p11 = scmp.lt.u32.totalorder %s860_s20, %s1186_s3 }
  0x3d   :  { %p866_p12 = pnand %p864_p11, %p861_p10 }
  0x3f   :  { %869 = shalt.err (!%p866_p12)
}
  0x40   :  { %s870_s0 = scalar_lea.vmem %s53_s17, 1024  ;;  %p875_p0 = scmp.lt.s32.totalorder %s53_s17, %s53_s17 }
  0x41   :  { %p871_p13 = scmp.ne.s32.totalorder %s53_s17, %s870_s0  ;;  %p876_p1 = scmp.lt.s32.totalorder %s870_s0, %s870_s0 }
  0x43   :  { %p877_p2 = por %p876_p1, %p875_p0 }
  0x45   :  { %p878_p3 = pnand %p877_p2, %p871_p13 }
  0x47   :  { %881 = shalt.err (!%p878_p3)
}
  0x48   :  { %58 = dma.hbm_to_vmem [thread:$0]  %s1186_s3, 1024, %s53_s17, [#allocation6], %s959_s23, %s959_s23, %s960_s24  }
  0x49   :  { %s882_s12 = scalar_lea.hbm %s1190_s7, 1024 }
  0x4a   :  { %p883_p4 = scmp.ne.s32.totalorder %s1190_s7, %s882_s12  ;;  %p886_p5 = scmp.lt.u32.totalorder %s882_s12, %s1190_s7 }
  0x4c   :  { %p888_p6 = pnand %p886_p5, %p883_p4 }
  0x4e   :  { %891 = shalt.err (!%p888_p6)
}
  0x4f   :  { %s892_s14 = scalar_lea.vmem %s81_s1, 1024  ;;  %p897_p8 = scmp.lt.s32.totalorder %s81_s1, %s81_s1 }
  0x50   :  { %p893_p7 = scmp.ne.s32.totalorder %s81_s1, %s892_s14  ;;  %p898_p9 = scmp.lt.s32.totalorder %s892_s14, %s892_s14 }
  0x52   :  { %p899_p10 = por %p898_p9, %p897_p8 }
  0x54   :  { %p900_p11 = pnand %p899_p10, %p893_p7 }
  0x56   :  { %903 = shalt.err (!%p900_p11)
}
  0x57   :  { %86 = dma.hbm_to_vmem [thread:$0]  %s1190_s7, 1024, %s81_s1, [#allocation9], %s959_s23, %s959_s23, %s960_s24  }
  0x58   :  { %948 = dma.done.wait [#allocation3], 128  }
  0x59   :  { %949 = vsyncadd [#allocation3], 4294967168 }
  0x5a   :  { %950 = dma.done.wait [#allocation6], 2048  }
  0x5b   :  { %951 = vsyncadd [#allocation6], 4294965248 }
  0x5c   :  { %952 = dma.done.wait [#allocation9], 2048  }
  0x5d   :  { %953 = vsyncadd [#allocation9], 4294965248  ;;  %v967_v0 = vmov 0.0   ;;  %vm968_vm0 = vmmov 0   ;;  %v758_v1 = vld [vmem:[#allocation5] sm:$0xff]   ;;  %v759_v2 = vld [vmem:[#allocation5 + $0x8] sm:$0xff]  }
  0x5e   :  { %665 = vmatprep.subr.bf16.mxu0 %v967_v0  ;;  %681 = vmatprep.mubr.msk.bf16.mxu0 %vm968_vm0, %v967_v0  ;;  %v760_v3 = vld [vmem:[#allocation5 + $0x10] sm:$0xff]   ;;  %v766_v4 = vld [vmem:[#allocation7] sm:$0xff]   ;;  %v761_v5 = vld [vmem:[#allocation5 + $0x18] sm:$0xff]  }
  0x5f   :  { %685 = vmatprep.subr.bf16.mxu1 %v967_v0  ;;  %701 = vmatprep.mubr.msk.bf16.mxu1 %vm968_vm0, %v967_v0  ;;  %v767_v6 = vld [vmem:[#allocation7 + $0x8] sm:$0xff]   ;;  %v762_v7 = vld [vmem:[#allocation5 + $0x20] sm:$0xff]   ;;  %v768_v8 = vld [vmem:[#allocation7 + $0x10] sm:$0xff]  }
  0x60   :  { %666 = vmatpush3.bf16.msra.mxu0 %v758_v1  ;;  %686 = vmatpush3.bf16.msra.mxu1 %v766_v4  ;;  %v763_v9 = vld [vmem:[#allocation5 + $0x28] sm:$0xff]   ;;  %v769_v10 = vld [vmem:[#allocation7 + $0x18] sm:$0xff]   ;;  %v764_v11 = vld [vmem:[#allocation5 + $0x30] sm:$0xff]  }
  0x61   :  { %667 = vmatprep.subr.bf16.mxu0 %v967_v0  ;;  %687 = vmatprep.subr.bf16.mxu1 %v967_v0  ;;  %v765_v12 = vld [vmem:[#allocation5 + $0x38] sm:$0xff]   ;;  %v770_v15 = vld [vmem:[#allocation7 + $0x20] sm:$0xff]   ;;  %v771_v16 = vld [vmem:[#allocation7 + $0x28] sm:$0xff]  }
  0x62   :  { %v105_v13 = vld [vmem:[#allocation2] sm:$0xff]  ;;  %v772_v17 = vld [vmem:[#allocation7 + $0x30] sm:$0xff]   ;;  %v774_v19 = vld [vmem:[#allocation8] sm:$0xff]  }
  0x63   :  { %v106_v14 = vpack.c.bf16 %v105_v13, %v105_v13  ;;  %v773_v18 = vld [vmem:[#allocation7 + $0x38] sm:$0xff]   ;;  %v775_v20 = vld [vmem:[#allocation8 + $0x8] sm:$0xff]   ;;  %v776_v21 = vld [vmem:[#allocation8 + $0x10] sm:$0xff]  }
  0x64   :  { %668 = vmatpush3.bf16.msra.mxu0 %v759_v2  ;;  %688 = vmatpush3.bf16.msra.mxu1 %v767_v6  ;;  %v777_v22 = vld [vmem:[#allocation8 + $0x18] sm:$0xff]   ;;  %v778_v23 = vld [vmem:[#allocation8 + $0x20] sm:$0xff]   ;;  %v779_v24 = vld [vmem:[#allocation8 + $0x28] sm:$0xff]  }
  0x65   :  { %669 = vmatprep.subr.bf16.mxu0 %v967_v0  ;;  %689 = vmatprep.subr.bf16.mxu1 %v967_v0  ;;  %v780_v25 = vld [vmem:[#allocation8 + $0x30] sm:$0xff]   ;;  %v593_v26 = vld [vmem:[%s1185_s2] ss:$0 sm:$0xff]  ;;  %v782_v35 = vld [vmem:[#allocation10] sm:$0xff]  }
  0x66   :  { %v781_v34 = vld [vmem:[#allocation8 + $0x38] sm:$0xff]   ;;  %v783_v36 = vld [vmem:[#allocation10 + $0x8] sm:$0xff]   ;;  %v784_v37 = vld [vmem:[#allocation10 + $0x10] sm:$0xff]  }
  0x67   :  { %v785_v38 = vld [vmem:[#allocation10 + $0x18] sm:$0xff]   ;;  %v786_v46 = vld [vmem:[#allocation10 + $0x20] sm:$0xff]   ;;  %v787_v47 = vld [vmem:[#allocation10 + $0x28] sm:$0xff]  }
  0x68   :  { %670 = vmatpush3.bf16.msra.mxu0 %v760_v3  ;;  %690 = vmatpush3.bf16.msra.mxu1 %v768_v8  ;;  %v602_v39 = vld [vmem:[%s1187_s4] ss:$0 sm:$0xff]  ;;  %v788_v48 = vld [vmem:[#allocation10 + $0x30] sm:$0xff]  }
  0x69   :  { %671 = vmatprep.subr.bf16.mxu0 %v967_v0  ;;  %691 = vmatprep.subr.bf16.mxu1 %v967_v0  ;;  %v789_v49 = vld [vmem:[#allocation10 + $0x38] sm:$0xff]  }
  0x6a   :  { %v611_v50 = vld [vmem:[%s1189_s6] ss:$0 sm:$0xff] }
  0x6b   :  { %v620_v58 = vld [vmem:[%s1191_s8] ss:$0 sm:$0xff] }
  0x6c   :  { %672 = vmatpush3.bf16.msra.mxu0 %v761_v5  ;;  %692 = vmatpush3.bf16.msra.mxu1 %v769_v10 }
  0x6d   :  { %673 = vmatprep.subr.bf16.mxu0 %v967_v0  ;;  %693 = vmatprep.subr.bf16.mxu1 %v967_v0 }
  0x70   :  { %674 = vmatpush3.bf16.msra.mxu0 %v762_v7  ;;  %694 = vmatpush3.bf16.msra.mxu1 %v770_v15 }
  0x71   :  { %675 = vmatprep.subr.bf16.mxu0 %v967_v0  ;;  %695 = vmatprep.subr.bf16.mxu1 %v967_v0 }
  0x74   :  { %676 = vmatpush3.bf16.msra.mxu0 %v763_v9  ;;  %696 = vmatpush3.bf16.msra.mxu1 %v771_v16 }
  0x75   :  { %677 = vmatprep.subr.bf16.mxu0 %v967_v0  ;;  %697 = vmatprep.subr.bf16.mxu1 %v967_v0 }
  0x78   :  { %678 = vmatpush3.bf16.msra.mxu0 %v764_v11  ;;  %698 = vmatpush3.bf16.msra.mxu1 %v772_v17 }
  0x79   :  { %679 = vmatprep.subr.bf16.mxu0 %v967_v0  ;;  %699 = vmatprep.subr.bf16.mxu1 %v967_v0 }
  0x7c   :  { %680 = vmatpush3.bf16.msra.mxu0 %v765_v12  ;;  %700 = vmatpush3.bf16.msra.mxu1 %v773_v18 }
  0x7d   :  { %705 = vmatprep.subr.bf16.mxu0 %v967_v0  ;;  %725 = vmatprep.subr.bf16.mxu1 %v967_v0 }
  0x7f   :  { %682 = vmatmul.mubr.bf16.vlgmr.msra.gmra.mrb[0].mxu0 %v106_v14 }
  0x80   :  { %721 = vmatprep.mubr.msk.bf16.mxu0 %vm968_vm0, %v967_v0  ;;  %706 = vmatpush3.bf16.msra.mxu0 %v774_v19 }
  0x81   :  { %707 = vmatprep.subr.bf16.mxu0 %v967_v0 }
  0x84   :  { %708 = vmatpush3.bf16.msra.mxu0 %v775_v20 }
  0x85   :  { %709 = vmatprep.subr.bf16.mxu0 %v967_v0 }
  0x88   :  { %710 = vmatpush3.bf16.msra.mxu0 %v776_v21 }
  0x89   :  { %711 = vmatprep.subr.bf16.mxu0 %v967_v0 }
  0x8c   :  { %712 = vmatpush3.bf16.msra.mxu0 %v777_v22 }
  0x8d   :  { %713 = vmatprep.subr.bf16.mxu0 %v967_v0 }
  0x90   :  { %714 = vmatpush3.bf16.msra.mxu0 %v778_v23 }
  0x91   :  { %715 = vmatprep.subr.bf16.mxu0 %v967_v0 }
  0x94   :  { %716 = vmatpush3.bf16.msra.mxu0 %v779_v24 }
  0x95   :  { %717 = vmatprep.subr.bf16.mxu0 %v967_v0 }
  0x98   :  { %718 = vmatpush3.bf16.msra.mxu0 %v780_v25 }
  0x99   :  { %719 = vmatprep.subr.bf16.mxu0 %v967_v0 }
  0x9c   :  { %720 = vmatpush3.bf16.msra.mxu0 %v781_v34 }
 0x152   :  { %v212_v27 = vpop.f32.mrb[0].mxu0 }
 0x153   :  { %v213_v28 = vadd.f32 %v593_v26, %v212_v27  ;;  %v683_v29 = vpop.f32.mrb[1].mxu0 }
 0x154   :  { %v215_v30 = vpop.f32.mrb[2].mxu0 }
 0x155   :  { %790 = vtanh.f32 %v213_v28  ;;  %v684_v31 = vpop.f32.mrb[3].mxu0 }
 0x15f   :  { %v791_v32 = vpop.eup %790 }
 0x160   :  { %v219_v33 = vpack.c.bf16 %v791_v32, %v791_v32 }
 0x162   :  { %702 = vmatmul.mubr.bf16.vlgmr.msra.gmra.mrb[0].mxu1 %v219_v33 }
 0x163   :  { %741 = vmatprep.mubr.msk.bf16.mxu1 %vm968_vm0, %v967_v0  ;;  %726 = vmatpush3.bf16.msra.mxu1 %v782_v35 }
 0x164   :  { %727 = vmatprep.subr.bf16.mxu1 %v967_v0 }
 0x167   :  { %728 = vmatpush3.bf16.msra.mxu1 %v783_v36 }
 0x168   :  { %729 = vmatprep.subr.bf16.mxu1 %v967_v0 }
 0x16b   :  { %730 = vmatpush3.bf16.msra.mxu1 %v784_v37 }
 0x16c   :  { %731 = vmatprep.subr.bf16.mxu1 %v967_v0 }
 0x16f   :  { %732 = vmatpush3.bf16.msra.mxu1 %v785_v38 }
 0x170   :  { %733 = vmatprep.subr.bf16.mxu1 %v967_v0 }
 0x173   :  { %734 = vmatpush3.bf16.msra.mxu1 %v786_v46 }
 0x174   :  { %735 = vmatprep.subr.bf16.mxu1 %v967_v0 }
 0x177   :  { %736 = vmatpush3.bf16.msra.mxu1 %v787_v47 }
 0x178   :  { %737 = vmatprep.subr.bf16.mxu1 %v967_v0 }
 0x17b   :  { %738 = vmatpush3.bf16.msra.mxu1 %v788_v48 }
 0x17c   :  { %739 = vmatprep.subr.bf16.mxu1 %v967_v0 }
 0x17f   :  { %740 = vmatpush3.bf16.msra.mxu1 %v789_v49 }
 0x235   :  { %v325_v40 = vpop.f32.mrb[0].mxu1 }
 0x236   :  { %v326_v41 = vadd.f32 %v602_v39, %v325_v40  ;;  %v703_v42 = vpop.f32.mrb[1].mxu1 }
 0x237   :  { %v328_v43 = vpop.f32.mrb[2].mxu1 }
 0x238   :  { %331 = vst [vmem:[#allocation12] sm:$0xff] %v326_v41  ;;  %v332_v44 = vpack.c.bf16 %v326_v41, %v326_v41  ;;  %v704_v45 = vpop.f32.mrb[3].mxu1 }
 0x23a   :  { %722 = vmatmul.mubr.bf16.vlgmr.msra.gmra.mrb[4].mxu0 %v332_v44 }
 0x30d   :  { %v438_v51 = vpop.f32.mrb[4].mxu0 }
 0x30e   :  { %v439_v52 = vadd.f32 %v611_v50, %v438_v51  ;;  %v723_v53 = vpop.f32.mrb[5].mxu0 }
 0x30f   :  { %v441_v54 = vpop.f32.mrb[6].mxu0 }
 0x310   :  { %792 = vtanh.f32 %v439_v52  ;;  %v724_v55 = vpop.f32.mrb[7].mxu0 }
 0x31a   :  { %v793_v56 = vpop.eup %792 }
 0x31b   :  { %v445_v57 = vpack.c.bf16 %v793_v56, %v793_v56 }
 0x31d   :  { %742 = vmatmul.mubr.bf16.vlgmr.msra.gmra.mrb[4].mxu1 %v445_v57 }
 0x3f0   :  { %v551_v59 = vpop.f32.mrb[4].mxu1 }
 0x3f1   :  { %v552_v60 = vadd.f32 %v620_v58, %v551_v59  ;;  %v743_v61 = vpop.f32.mrb[5].mxu1 }
 0x3f2   :  { %v554_v62 = vpop.f32.mrb[6].mxu1 }
 0x3f3   :  { %557 = vst [vmem:[#allocation11] sm:$0xff] %v552_v60  ;;  %v744_v63 = vpop.f32.mrb[7].mxu1 }
 0x3f4   :  { %562 = vsyncadd [#allocation4], 96  ;;  %s969_s6 = smov [#allocation11]  }
 0x3f5   :  { %s563_s21 = sshll.u32 %s969_s6, 4  ;;  %s564_s21 = int_to_ptr.vmem [resolvable:$true] %s563_s21 }
 0x3f6   :  { %s904_s22 = scalar_lea.vmem %s564_s21, 32  ;;  %s908_s25 = scalar_lea.vmem %s564_s21, 128 }
 0x3f7   :  { %p905_p12 = scmp.ne.s32.totalorder %s564_s21, %s904_s22  ;;  %p909_p13 = scmp.lt.s32.totalorder %s564_s21, %s564_s21 }
 0x3f8   :  { %p910_p0 = scmp.lt.s32.totalorder %s908_s25, %s904_s22 }
 0x3fa   :  { %p911_p1 = por %p910_p0, %p909_p13 }
 0x3fc   :  { %p912_p2 = pnand %p911_p1, %p905_p12 }
 0x3fe   :  { %915 = shalt.err (!%p912_p2)
}
 0x3ff   :  { %s916_s0 = scalar_lea.hbm %s1192_s9, 32 }
 0x400   :  { %p917_p3 = scmp.ne.s32.totalorder %s1192_s9, %s916_s0  ;;  %p920_p4 = scmp.lt.u32.totalorder %s916_s0, %s1192_s9 }
 0x402   :  { %p922_p5 = pnand %p920_p4, %p917_p3 }
 0x404   :  { %925 = shalt.err (!%p922_p5)
}
 0x405   :  { %569 = dma.vmem_to_hbm [thread:$0]  %s564_s21, 32, %s1192_s9, [#allocation4], %s963_s5, %s963_s5, %s964_s28  }
 0x406   :  { %574 = vsyncadd [#allocation13], 96  ;;  %s970_s15 = smov [#allocation12]  }
 0x407   :  { %s575_s16 = sshll.u32 %s970_s15, 4  ;;  %s576_s16 = int_to_ptr.vmem [resolvable:$true] %s575_s16 }
 0x408   :  { %s926_s18 = scalar_lea.vmem %s576_s16, 32  ;;  %s930_s14 = scalar_lea.vmem %s576_s16, 128 }
 0x409   :  { %p927_p6 = scmp.ne.s32.totalorder %s576_s16, %s926_s18  ;;  %p931_p7 = scmp.lt.s32.totalorder %s576_s16, %s576_s16 }
 0x40a   :  { %p932_p8 = scmp.lt.s32.totalorder %s930_s14, %s926_s18 }
 0x40c   :  { %p933_p9 = por %p932_p8, %p931_p7 }
 0x40e   :  { %p934_p10 = pnand %p933_p9, %p927_p6 }
 0x410   :  { %937 = shalt.err (!%p934_p10)
}
 0x411   :  { %s938_s7 = scalar_lea.hbm %s1193_s10, 32 }
 0x412   :  { %p939_p11 = scmp.ne.s32.totalorder %s1193_s10, %s938_s7  ;;  %p942_p12 = scmp.lt.u32.totalorder %s938_s7, %s1193_s10 }
 0x414   :  { %p944_p13 = pnand %p942_p12, %p939_p11 }
 0x416   :  { %947 = shalt.err (!%p944_p13)
}
 0x417   :  { %581 = dma.vmem_to_hbm [thread:$0]  %s576_s16, 32, %s1193_s10, [#allocation13], %s963_s5, %s963_s5, %s964_s28  }
 0x418   :  { %954 = dma.done.wait [#allocation4], 128  }
 0x419   :  { %955 = vsyncadd [#allocation4], 4294967168 }
 0x41a   :  { %956 = dma.done.wait [#allocation13], 128  }
 0x41b   :  { %957 = vsyncadd [#allocation13], 4294967168 }
 0x41c   :  { %588 = vsyncpa [#allocation3], 1 }
 0x41d   :  { %589 = vsyncpa [#allocation6], 1 }
 0x41e   :  { %590 = vsyncpa [#allocation9], 1 }
 0x41f   :  { %591 = vsyncpa [#allocation4], 1 }
 0x420   :  { %592 = vsyncpa [#allocation13], 1 }

</bundles_post_ra>
